<compile_context>
chip_gen: v7x
topology: tpu7x:2x2x1
jax: 0.10.0
libtpu: 0.0.40
codegen_flags: <defaults>
</compile_context>

<pallas_src>
import functools

import jax
import jax.numpy as jnp
from jax import lax
from jax.experimental import pallas as pl
from jax.experimental.pallas import tpu as pltpu

EPS = 1e-5  # PyTorch nn.LayerNorm default eps

# ----------------------- small model config (scaled-down CLIP) -----------------------
# Real module: vocab=49408, n_embd=768, n_tokens=77, 12 layers, 12 heads.
N_VOCAB = 256
N_EMBD = 128          # lane-dense (multiple of 128); real model uses 768
N_TOKENS = 8
N_HEAD = 4            # dh = 32
N_LAYERS = 2
BATCH = 2
BATCH_BLOCK = 1       # batch rows per grid step (keeps a parallel axis of size 2)


def _layernorm(x, g, b):
    mu = jnp.mean(x, axis=-1, keepdims=True)
    var = jnp.mean(jnp.square(x - mu), axis=-1, keepdims=True)
    return (x - mu) * lax.rsqrt(var + EPS) * g + b


# --------------------------------- embedding kernel ---------------------------------
def clip_embedding_kernel(tok_ref, tab_ref, pos_ref, o_ref, emb_scr, sem):
    # tok_ref: (B, T) int32 in SMEM (scalar prefetch); tab_ref: (V, D) in HBM;
    # pos_ref: (T, D) VMEM; o_ref: (1, T, D); emb_scr: (T, D) VMEM; sem: DMA (T,)
    b = pl.program_id(0)
    T = emb_scr.shape[0]
    copies = []
    for t in range(T):  # static unroll; all T row-DMAs are in flight at once
        tok = tok_ref[b, t]
        cp = pltpu.make_async_copy(tab_ref.at[pl.ds(tok, 1)],
                                   emb_scr.at[pl.ds(t, 1)],
                                   sem.at[t])
        cp.start()
        copies.append(cp)
    for cp in copies:
        cp.wait()
    o_ref[0] = emb_scr[...] + pos_ref[...]


# ------------------------- fused transformer-stack kernel ---------------------------
def clip_layers_kernel(x_ref, g1_ref, b1_ref, wqkv_ref, bqkv_ref, wo_ref, bo_ref,
                       g2_ref, b2_ref, w1_ref, bm1_ref, w2_ref, bm2_ref,
                       gf_ref, bf_ref, o_ref, x_scr, *, n_head):
    l = pl.program_id(1)
    n_layers = pl.num_programs(1)
    BB, T, D = x_scr.shape
    dh = D // n_head
    scale = jnp.float32(1.0) / jnp.sqrt(jnp.float32(dh))

    @pl.when(l == 0)
    def _load_x():
        x_scr[...] = x_ref[...].astype(jnp.float32)

    x = x_scr[...].reshape(BB * T, D)  # f32, resident across the layer axis

    # ---------------- attention block ----------------
    h = _layernorm(x, g1_ref[0], b1_ref[0]).astype(jnp.bfloat16)
    qkv = jnp.dot(h, wqkv_ref[0], preferred_element_type=jnp.float32) + bqkv_ref[0]

    def split_heads(t2d):  # (BB*T, D) f32 -> (BB*n_head, T, dh) bf16
        t2d = t2d.astype(jnp.bfloat16)
        parts = [t2d[b * T:(b + 1) * T, hd * dh:(hd + 1) * dh]
                 for b in range(BB) for hd in range(n_head)]
        return jnp.stack(parts, axis=0)

    q = split_heads(qkv[:, :D])
    k = split_heads(qkv[:, D:2 * D])
    v = split_heads(qkv[:, 2 * D:])

    # batched over (batch, head): one score matmul + one softmax + one PV matmul
    s = jnp.einsum('bqd,bkd->bqk', q, k, preferred_element_type=jnp.float32)
    row = lax.broadcasted_iota(jnp.int32, (T, T), 0)
    col = lax.broadcasted_iota(jnp.int32, (T, T), 1)
    s = jnp.where(col > row, -jnp.inf, s) * scale  # masked_fill(-inf) then / sqrt(dh)
    m = jnp.max(s, axis=-1, keepdims=True)
    p = jnp.exp(s - m)
    p = p * pl.reciprocal(jnp.sum(p, axis=-1, keepdims=True), approx=True)
    o = jnp.einsum('bqk,bkd->bqd', p.astype(jnp.bfloat16), v,
                   preferred_element_type=jnp.float32)  # (BB*H, T, dh)

    # merge heads back to a lane-dense (BB*T, D) tile -> ONE fused out-projection
    o = jnp.concatenate(
        [jnp.concatenate([o[b * n_head + hd] for hd in range(n_head)], axis=-1)
         for b in range(BB)], axis=0).astype(jnp.bfloat16)
    attn = jnp.dot(o, wo_ref[0], preferred_element_type=jnp.float32) + bo_ref[0]
    x = x + attn  # residual

    # ---------------- MLP block ----------------
    h = _layernorm(x, g2_ref[0], b2_ref[0]).astype(jnp.bfloat16)
    h = jnp.dot(h, w1_ref[0], preferred_element_type=jnp.float32) + bm1_ref[0]
    h = h * jax.nn.sigmoid(1.702 * h)  # quick-GELU (f32)
    h = jnp.dot(h.astype(jnp.bfloat16), w2_ref[0],
                preferred_element_type=jnp.float32) + bm2_ref[0]
    x = x + h  # residual

    x_scr[...] = x.reshape(BB, T, D)

    @pl.when(l == n_layers - 1)
    def _finalize():
        y = _layernorm(x, gf_ref[...], bf_ref[...])
        o_ref[...] = y.reshape(BB, T, D).astype(o_ref.dtype)


# ------------------------------------- wrapper --------------------------------------
def clip_forward(tokens, params, n_head=N_HEAD, batch_block=BATCH_BLOCK):
    tokens = tokens.astype(jnp.int32)
    B, T = tokens.shape
    V, D = params["tok_emb"].shape
    L = params["wqkv"].shape[0]
    BB = batch_block
    assert B % BB == 0

    # ---- gather-based embedding (table stays in HBM) ----
    x = pl.pallas_call(
        clip_embedding_kernel,
        out_shape=jax.ShapeDtypeStruct((B, T, D), jnp.float32),
        grid_spec=pltpu.PrefetchScalarGridSpec(
            num_scalar_prefetch=1,
            grid=(B,),
            in_specs=[pl.BlockSpec(memory_space=pl.ANY),               # token table (HBM)
                      pl.BlockSpec((T, D), lambda b, tok: (0, 0))],    # pos emb
            out_specs=pl.BlockSpec((1, T, D), lambda b, tok: (b, 0, 0)),
            scratch_shapes=[pltpu.VMEM((T, D), jnp.float32),
                            pltpu.SemaphoreType.DMA((T,))]),
        compiler_params=pltpu.CompilerParams(dimension_semantics=("arbitrary",)),
    )(tokens, params["tok_emb"], params["pos_emb"])

    # ---- all layers + final LN fused into one pipelined pallas_call ----
    w_spec = lambda *shape: pl.BlockSpec((1,) + shape, lambda bi, l: (l, 0, 0))
    layer_fn = pl.pallas_call(
        functools.partial(clip_layers_kernel, n_head=n_head),
        out_shape=jax.ShapeDtypeStruct((B, T, D), jnp.float32),
        grid_spec=pltpu.PrefetchScalarGridSpec(
            num_scalar_prefetch=0,
            grid=(B // BB, L),
            in_specs=[
                pl.BlockSpec((BB, T, D), lambda bi, l: (bi, 0, 0)),  # x (fetched once per bi)
                w_spec(1, D), w_spec(1, D),                          # ln1 gamma/beta
                w_spec(D, 3 * D), w_spec(1, 3 * D),                  # in_proj W/b
                w_spec(D, D), w_spec(1, D),                          # out_proj W/b
                w_spec(1, D), w_spec(1, D),                          # ln2 gamma/beta
                w_spec(D, 4 * D), w_spec(1, 4 * D),                  # linear_1 W/b
                w_spec(4 * D, D), w_spec(1, D),                      # linear_2 W/b
                pl.BlockSpec((1, D), lambda bi, l: (0, 0)),          # final LN gamma
                pl.BlockSpec((1, D), lambda bi, l: (0, 0)),          # final LN beta
            ],
            out_specs=pl.BlockSpec((BB, T, D), lambda bi, l: (bi, 0, 0)),
            scratch_shapes=[pltpu.VMEM((BB, T, D), jnp.float32)]),
        compiler_params=pltpu.CompilerParams(
            dimension_semantics=("parallel", "arbitrary"),
            vmem_limit_bytes=32 * 1024 * 1024),
    )
    return layer_fn(x, params["g1"], params["b1"], params["wqkv"], params["bqkv"],
                    params["wo"], params["bo"], params["g2"], params["b2"],
                    params["w1"], params["bm1"], params["w2"], params["bm2"],
                    params["gf"], params["bf"])


# --------------------------- pure-JAX reference (for checking) ----------------------
def clip_reference(tokens, params, n_head=N_HEAD):
    tokens = tokens.astype(jnp.int32)
    x = params["tok_emb"][tokens] + params["pos_emb"][None]
    B, T, D = x.shape
    dh = D // n_head
    L = params["wqkv"].shape[0]
    f32 = lambda a: a.astype(jnp.float32)
    mask = jnp.triu(jnp.ones((T, T), bool), 1)
    for l in range(L):
        res = x
        h = _layernorm(x, params["g1"][l], params["b1"][l])
        qkv = h @ f32(params["wqkv"][l]) + params["bqkv"][l]
        q, k, v = jnp.split(qkv, 3, axis=-1)
        q = q.reshape(B, T, n_head, dh).transpose(0, 2, 1, 3)
        k = k.reshape(B, T, n_head, dh).transpose(0, 2, 1, 3)
        v = v.reshape(B, T, n_head, dh).transpose(0, 2, 1, 3)
        s = q @ jnp.swapaxes(k, -1, -2)
        s = jnp.where(mask, -jnp.inf, s) / jnp.sqrt(jnp.float32(dh))
        p = jax.nn.softmax(s, axis=-1)
        o = (p @ v).transpose(0, 2, 1, 3).reshape(B, T, D)
        x = res + (o @ f32(params["wo"][l]) + params["bo"][l])
        res = x
        h = _layernorm(x, params["g2"][l], params["b2"][l])
        h = h @ f32(params["w1"][l]) + params["bm1"][l]
        h = h * jax.nn.sigmoid(1.702 * h)
        x = res + (h @ f32(params["w2"][l]) + params["bm2"][l])
    return _layernorm(x, params["gf"], params["bf"])


# -------------------------------- deterministic params ------------------------------
def init_params(key, V=N_VOCAB, D=N_EMBD, T=N_TOKENS, L=N_LAYERS):
    def nrm(k, shape, dtype=jnp.float32, scale=0.02):
        return (scale * jax.random.normal(k, shape, jnp.float32)).astype(dtype)

    bf16 = jnp.bfloat16
    ks = jax.random.split(key, 10)
    return {
        "tok_emb": nrm(ks[0], (V, D)),
        "pos_emb": nrm(ks[1], (T, D)),  # module inits to zeros; random keeps it nontrivial
        "gf": jnp.ones((1, D), jnp.float32), "bf": jnp.zeros((1, D), jnp.float32),
        "g1": jnp.ones((L, 1, D), jnp.float32), "b1": jnp.zeros((L, 1, D), jnp.float32),
        "wqkv": nrm(ks[2], (L, D, 3 * D), bf16), "bqkv": nrm(ks[3], (L, 1, 3 * D)),
        "wo": nrm(ks[4], (L, D, D), bf16), "bo": nrm(ks[5], (L, 1, D)),
        "g2": jnp.ones((L, 1, D), jnp.float32), "b2": jnp.zeros((L, 1, D), jnp.float32),
        "w1": nrm(ks[6], (L, D, 4 * D), bf16), "bm1": nrm(ks[7], (L, 1, 4 * D)),
        "w2": nrm(ks[8], (L, 4 * D, D), bf16), "bm2": nrm(ks[9], (L, 1, D)),
    }


if __name__ == "__main__":
    key = jax.random.PRNGKey(0)
    pkey, tkey = jax.random.split(key)
    params = init_params(pkey)
    tokens = jax.random.randint(tkey, (BATCH, N_TOKENS), 0, N_VOCAB, dtype=jnp.int32)

    out = clip_forward(tokens, params)
    out = jax.block_until_ready(out)

    ref = clip_reference(tokens, params)
    assert out.shape == (BATCH, N_TOKENS, N_EMBD)
    err = float(jnp.max(jnp.abs(out - ref)))
    # bf16 matmul operands + approx reciprocal vs a pure-f32 reference
    assert err < 5e-2, err
    print("KERNEL_OK")
</pallas_src>

<mosaic_0001>
module attributes {stable_mosaic.version = 11 : i64} {
  func.func @clip_embedding_kernel(%arg0: i32, %arg1: memref<2x8xi32, #tpu.memory_space<smem>>, %arg2: memref<256x128xf32, #tpu.memory_space<any>>, %arg3: memref<8x128xf32, #tpu.memory_space<vmem>>, %arg4: memref<1x8x128xf32, #tpu.memory_space<vmem>>, %arg5: memref<8x128xf32, #tpu.memory_space<vmem>>, %arg6: memref<8x!tpu.dma_semaphore, #tpu.memory_space<semaphore_mem>>) attributes {dimension_semantics = [#tpu.dimension_semantics<arbitrary>], iteration_bounds = array<i64: 2>, scalar_prefetch = 1 : i64, scratch_operands = 2 : i64, tpu.core_type = #tpu.core_type<tc>, window_params = [{}, {pipeline_mode = #tpu.pipeline_mode<synchronous>, transform_indices = @transform_1, window_bounds = array<i64: 8, 128>}, {transform_indices = @transform_2, window_bounds = array<i64: 1, 8, 128>}]} {
    %0 = arith.index_cast %arg0 : i32 to index
    %c0 = arith.constant 0 : index
    %1 = memref.load %arg1[%0, %c0] : memref<2x8xi32, #tpu.memory_space<smem>>
    %c0_i32 = arith.constant 0 : i32
    %c0_i32_0 = arith.constant 0 : i32
    %2 = tpu.memref_slice %arg2[%1, %c0_i32_0] : memref<256x128xf32, #tpu.memory_space<any>> -> memref<1x128xf32, #tpu.memory_space<any>>
    %c0_i32_1 = arith.constant 0 : i32
    %c0_i32_2 = arith.constant 0 : i32
    %3 = tpu.memref_slice %arg5[%c0_i32_1, %c0_i32_2] : memref<8x128xf32, #tpu.memory_space<vmem>> -> memref<1x128xf32, #tpu.memory_space<vmem>>
    %4 = tpu.memref_slice %arg6[%c0_i32] : memref<8x!tpu.dma_semaphore, #tpu.memory_space<semaphore_mem>> -> memref<1x!tpu.dma_semaphore, #tpu.memory_space<semaphore_mem>>
    %5 = tpu.memref_squeeze %4 : memref<1x!tpu.dma_semaphore, #tpu.memory_space<semaphore_mem>> -> memref<!tpu.dma_semaphore, #tpu.memory_space<semaphore_mem>>
    tpu.enqueue_dma source(%2 : memref<1x128xf32, #tpu.memory_space<any>>) target(%3 : memref<1x128xf32, #tpu.memory_space<vmem>>) target_semaphore(%5 : memref<!tpu.dma_semaphore, #tpu.memory_space<semaphore_mem>>)
    %6 = arith.index_cast %arg0 : i32 to index
    %c1 = arith.constant 1 : index
    %7 = memref.load %arg1[%6, %c1] : memref<2x8xi32, #tpu.memory_space<smem>>
    %c1_i32 = arith.constant 1 : i32
    %c0_i32_3 = arith.constant 0 : i32
    %8 = tpu.memref_slice %arg2[%7, %c0_i32_3] : memref<256x128xf32, #tpu.memory_space<any>> -> memref<1x128xf32, #tpu.memory_space<any>>
    %c1_i32_4 = arith.constant 1 : i32
    %c0_i32_5 = arith.constant 0 : i32
    %9 = tpu.memref_slice %arg5[%c1_i32_4, %c0_i32_5] : memref<8x128xf32, #tpu.memory_space<vmem>> -> memref<1x128xf32, #tpu.memory_space<vmem>>
    %10 = tpu.memref_slice %arg6[%c1_i32] : memref<8x!tpu.dma_semaphore, #tpu.memory_space<semaphore_mem>> -> memref<1x!tpu.dma_semaphore, #tpu.memory_space<semaphore_mem>>
    %11 = tpu.memref_squeeze %10 : memref<1x!tpu.dma_semaphore, #tpu.memory_space<semaphore_mem>> -> memref<!tpu.dma_semaphore, #tpu.memory_space<semaphore_mem>>
    tpu.enqueue_dma source(%8 : memref<1x128xf32, #tpu.memory_space<any>>) target(%9 : memref<1x128xf32, #tpu.memory_space<vmem>>) target_semaphore(%11 : memref<!tpu.dma_semaphore, #tpu.memory_space<semaphore_mem>>)
    %12 = arith.index_cast %arg0 : i32 to index
    %c2 = arith.constant 2 : index
    %13 = memref.load %arg1[%12, %c2] : memref<2x8xi32, #tpu.memory_space<smem>>
    %c2_i32 = arith.constant 2 : i32
    %c0_i32_6 = arith.constant 0 : i32
    %14 = tpu.memref_slice %arg2[%13, %c0_i32_6] : memref<256x128xf32, #tpu.memory_space<any>> -> memref<1x128xf32, #tpu.memory_space<any>>
    %c2_i32_7 = arith.constant 2 : i32
    %c0_i32_8 = arith.constant 0 : i32
    %15 = tpu.memref_slice %arg5[%c2_i32_7, %c0_i32_8] : memref<8x128xf32, #tpu.memory_space<vmem>> -> memref<1x128xf32, #tpu.memory_space<vmem>>
    %16 = tpu.memref_slice %arg6[%c2_i32] : memref<8x!tpu.dma_semaphore, #tpu.memory_space<semaphore_mem>> -> memref<1x!tpu.dma_semaphore, #tpu.memory_space<semaphore_mem>>
    %17 = tpu.memref_squeeze %16 : memref<1x!tpu.dma_semaphore, #tpu.memory_space<semaphore_mem>> -> memref<!tpu.dma_semaphore, #tpu.memory_space<semaphore_mem>>
    tpu.enqueue_dma source(%14 : memref<1x128xf32, #tpu.memory_space<any>>) target(%15 : memref<1x128xf32, #tpu.memory_space<vmem>>) target_semaphore(%17 : memref<!tpu.dma_semaphore, #tpu.memory_space<semaphore_mem>>)
    %18 = arith.index_cast %arg0 : i32 to index
    %c3 = arith.constant 3 : index
    %19 = memref.load %arg1[%18, %c3] : memref<2x8xi32, #tpu.memory_space<smem>>
    %c3_i32 = arith.constant 3 : i32
    %c0_i32_9 = arith.constant 0 : i32
    %20 = tpu.memref_slice %arg2[%19, %c0_i32_9] : memref<256x128xf32, #tpu.memory_space<any>> -> memref<1x128xf32, #tpu.memory_space<any>>
    %c3_i32_10 = arith.constant 3 : i32
    %c0_i32_11 = arith.constant 0 : i32
    %21 = tpu.memref_slice %arg5[%c3_i32_10, %c0_i32_11] : memref<8x128xf32, #tpu.memory_space<vmem>> -> memref<1x128xf32, #tpu.memory_space<vmem>>
    %22 = tpu.memref_slice %arg6[%c3_i32] : memref<8x!tpu.dma_semaphore, #tpu.memory_space<semaphore_mem>> -> memref<1x!tpu.dma_semaphore, #tpu.memory_space<semaphore_mem>>
    %23 = tpu.memref_squeeze %22 : memref<1x!tpu.dma_semaphore, #tpu.memory_space<semaphore_mem>> -> memref<!tpu.dma_semaphore, #tpu.memory_space<semaphore_mem>>
    tpu.enqueue_dma source(%20 : memref<1x128xf32, #tpu.memory_space<any>>) target(%21 : memref<1x128xf32, #tpu.memory_space<vmem>>) target_semaphore(%23 : memref<!tpu.dma_semaphore, #tpu.memory_space<semaphore_mem>>)
    %24 = arith.index_cast %arg0 : i32 to index
    %c4 = arith.constant 4 : index
    %25 = memref.load %arg1[%24, %c4] : memref<2x8xi32, #tpu.memory_space<smem>>
    %c4_i32 = arith.constant 4 : i32
    %c0_i32_12 = arith.constant 0 : i32
    %26 = tpu.memref_slice %arg2[%25, %c0_i32_12] : memref<256x128xf32, #tpu.memory_space<any>> -> memref<1x128xf32, #tpu.memory_space<any>>
    %c4_i32_13 = arith.constant 4 : i32
    %c0_i32_14 = arith.constant 0 : i32
    %27 = tpu.memref_slice %arg5[%c4_i32_13, %c0_i32_14] : memref<8x128xf32, #tpu.memory_space<vmem>> -> memref<1x128xf32, #tpu.memory_space<vmem>>
    %28 = tpu.memref_slice %arg6[%c4_i32] : memref<8x!tpu.dma_semaphore, #tpu.memory_space<semaphore_mem>> -> memref<1x!tpu.dma_semaphore, #tpu.memory_space<semaphore_mem>>
    %29 = tpu.memref_squeeze %28 : memref<1x!tpu.dma_semaphore, #tpu.memory_space<semaphore_mem>> -> memref<!tpu.dma_semaphore, #tpu.memory_space<semaphore_mem>>
    tpu.enqueue_dma source(%26 : memref<1x128xf32, #tpu.memory_space<any>>) target(%27 : memref<1x128xf32, #tpu.memory_space<vmem>>) target_semaphore(%29 : memref<!tpu.dma_semaphore, #tpu.memory_space<semaphore_mem>>)
    %30 = arith.index_cast %arg0 : i32 to index
    %c5 = arith.constant 5 : index
    %31 = memref.load %arg1[%30, %c5] : memref<2x8xi32, #tpu.memory_space<smem>>
    %c5_i32 = arith.constant 5 : i32
    %c0_i32_15 = arith.constant 0 : i32
    %32 = tpu.memref_slice %arg2[%31, %c0_i32_15] : memref<256x128xf32, #tpu.memory_space<any>> -> memref<1x128xf32, #tpu.memory_space<any>>
    %c5_i32_16 = arith.constant 5 : i32
    %c0_i32_17 = arith.constant 0 : i32
    %33 = tpu.memref_slice %arg5[%c5_i32_16, %c0_i32_17] : memref<8x128xf32, #tpu.memory_space<vmem>> -> memref<1x128xf32, #tpu.memory_space<vmem>>
    %34 = tpu.memref_slice %arg6[%c5_i32] : memref<8x!tpu.dma_semaphore, #tpu.memory_space<semaphore_mem>> -> memref<1x!tpu.dma_semaphore, #tpu.memory_space<semaphore_mem>>
    %35 = tpu.memref_squeeze %34 : memref<1x!tpu.dma_semaphore, #tpu.memory_space<semaphore_mem>> -> memref<!tpu.dma_semaphore, #tpu.memory_space<semaphore_mem>>
    tpu.enqueue_dma source(%32 : memref<1x128xf32, #tpu.memory_space<any>>) target(%33 : memref<1x128xf32, #tpu.memory_space<vmem>>) target_semaphore(%35 : memref<!tpu.dma_semaphore, #tpu.memory_space<semaphore_mem>>)
    %36 = arith.index_cast %arg0 : i32 to index
    %c6 = arith.constant 6 : index
    %37 = memref.load %arg1[%36, %c6] : memref<2x8xi32, #tpu.memory_space<smem>>
    %c6_i32 = arith.constant 6 : i32
    %c0_i32_18 = arith.constant 0 : i32
    %38 = tpu.memref_slice %arg2[%37, %c0_i32_18] : memref<256x128xf32, #tpu.memory_space<any>> -> memref<1x128xf32, #tpu.memory_space<any>>
    %c6_i32_19 = arith.constant 6 : i32
    %c0_i32_20 = arith.constant 0 : i32
    %39 = tpu.memref_slice %arg5[%c6_i32_19, %c0_i32_20] : memref<8x128xf32, #tpu.memory_space<vmem>> -> memref<1x128xf32, #tpu.memory_space<vmem>>
    %40 = tpu.memref_slice %arg6[%c6_i32] : memref<8x!tpu.dma_semaphore, #tpu.memory_space<semaphore_mem>> -> memref<1x!tpu.dma_semaphore, #tpu.memory_space<semaphore_mem>>
    %41 = tpu.memref_squeeze %40 : memref<1x!tpu.dma_semaphore, #tpu.memory_space<semaphore_mem>> -> memref<!tpu.dma_semaphore, #tpu.memory_space<semaphore_mem>>
    tpu.enqueue_dma source(%38 : memref<1x128xf32, #tpu.memory_space<any>>) target(%39 : memref<1x128xf32, #tpu.memory_space<vmem>>) target_semaphore(%41 : memref<!tpu.dma_semaphore, #tpu.memory_space<semaphore_mem>>)
    %42 = arith.index_cast %arg0 : i32 to index
    %c7 = arith.constant 7 : index
    %43 = memref.load %arg1[%42, %c7] : memref<2x8xi32, #tpu.memory_space<smem>>
    %c7_i32 = arith.constant 7 : i32
    %c0_i32_21 = arith.constant 0 : i32
    %44 = tpu.memref_slice %arg2[%43, %c0_i32_21] : memref<256x128xf32, #tpu.memory_space<any>> -> memref<1x128xf32, #tpu.memory_space<any>>
    %c7_i32_22 = arith.constant 7 : i32
    %c0_i32_23 = arith.constant 0 : i32
    %45 = tpu.memref_slice %arg5[%c7_i32_22, %c0_i32_23] : memref<8x128xf32, #tpu.memory_space<vmem>> -> memref<1x128xf32, #tpu.memory_space<vmem>>
    %46 = tpu.memref_slice %arg6[%c7_i32] : memref<8x!tpu.dma_semaphore, #tpu.memory_space<semaphore_mem>> -> memref<1x!tpu.dma_semaphore, #tpu.memory_space<semaphore_mem>>
    %47 = tpu.memref_squeeze %46 : memref<1x!tpu.dma_semaphore, #tpu.memory_space<semaphore_mem>> -> memref<!tpu.dma_semaphore, #tpu.memory_space<semaphore_mem>>
    tpu.enqueue_dma source(%44 : memref<1x128xf32, #tpu.memory_space<any>>) target(%45 : memref<1x128xf32, #tpu.memory_space<vmem>>) target_semaphore(%47 : memref<!tpu.dma_semaphore, #tpu.memory_space<semaphore_mem>>)
    %c0_i32_24 = arith.constant 0 : i32
    %c0_i32_25 = arith.constant 0 : i32
    %48 = tpu.memref_slice %arg2[%1, %c0_i32_25] : memref<256x128xf32, #tpu.memory_space<any>> -> memref<1x128xf32, #tpu.memory_space<any>>
    %c0_i32_26 = arith.constant 0 : i32
    %c0_i32_27 = arith.constant 0 : i32
    %49 = tpu.memref_slice %arg5[%c0_i32_26, %c0_i32_27] : memref<8x128xf32, #tpu.memory_space<vmem>> -> memref<1x128xf32, #tpu.memory_space<vmem>>
    %50 = tpu.memref_slice %arg6[%c0_i32_24] : memref<8x!tpu.dma_semaphore, #tpu.memory_space<semaphore_mem>> -> memref<1x!tpu.dma_semaphore, #tpu.memory_space<semaphore_mem>>
    %51 = tpu.memref_squeeze %50 : memref<1x!tpu.dma_semaphore, #tpu.memory_space<semaphore_mem>> -> memref<!tpu.dma_semaphore, #tpu.memory_space<semaphore_mem>>
    tpu.wait_dma2 semaphore(%51 : memref<!tpu.dma_semaphore, #tpu.memory_space<semaphore_mem>>) src(%48 : memref<1x128xf32, #tpu.memory_space<any>>) dst(%49 : memref<1x128xf32, #tpu.memory_space<vmem>>)
    %c1_i32_28 = arith.constant 1 : i32
    %c0_i32_29 = arith.constant 0 : i32
    %52 = tpu.memref_slice %arg2[%7, %c0_i32_29] : memref<256x128xf32, #tpu.memory_space<any>> -> memref<1x128xf32, #tpu.memory_space<any>>
    %c1_i32_30 = arith.constant 1 : i32
    %c0_i32_31 = arith.constant 0 : i32
    %53 = tpu.memref_slice %arg5[%c1_i32_30, %c0_i32_31] : memref<8x128xf32, #tpu.memory_space<vmem>> -> memref<1x128xf32, #tpu.memory_space<vmem>>
    %54 = tpu.memref_slice %arg6[%c1_i32_28] : memref<8x!tpu.dma_semaphore, #tpu.memory_space<semaphore_mem>> -> memref<1x!tpu.dma_semaphore, #tpu.memory_space<semaphore_mem>>
    %55 = tpu.memref_squeeze %54 : memref<1x!tpu.dma_semaphore, #tpu.memory_space<semaphore_mem>> -> memref<!tpu.dma_semaphore, #tpu.memory_space<semaphore_mem>>
    tpu.wait_dma2 semaphore(%55 : memref<!tpu.dma_semaphore, #tpu.memory_space<semaphore_mem>>) src(%52 : memref<1x128xf32, #tpu.memory_space<any>>) dst(%53 : memref<1x128xf32, #tpu.memory_space<vmem>>)
    %c2_i32_32 = arith.constant 2 : i32
    %c0_i32_33 = arith.constant 0 : i32
    %56 = tpu.memref_slice %arg2[%13, %c0_i32_33] : memref<256x128xf32, #tpu.memory_space<any>> -> memref<1x128xf32, #tpu.memory_space<any>>
    %c2_i32_34 = arith.constant 2 : i32
    %c0_i32_35 = arith.constant 0 : i32
    %57 = tpu.memref_slice %arg5[%c2_i32_34, %c0_i32_35] : memref<8x128xf32, #tpu.memory_space<vmem>> -> memref<1x128xf32, #tpu.memory_space<vmem>>
    %58 = tpu.memref_slice %arg6[%c2_i32_32] : memref<8x!tpu.dma_semaphore, #tpu.memory_space<semaphore_mem>> -> memref<1x!tpu.dma_semaphore, #tpu.memory_space<semaphore_mem>>
    %59 = tpu.memref_squeeze %58 : memref<1x!tpu.dma_semaphore, #tpu.memory_space<semaphore_mem>> -> memref<!tpu.dma_semaphore, #tpu.memory_space<semaphore_mem>>
    tpu.wait_dma2 semaphore(%59 : memref<!tpu.dma_semaphore, #tpu.memory_space<semaphore_mem>>) src(%56 : memref<1x128xf32, #tpu.memory_space<any>>) dst(%57 : memref<1x128xf32, #tpu.memory_space<vmem>>)
    %c3_i32_36 = arith.constant 3 : i32
    %c0_i32_37 = arith.constant 0 : i32
    %60 = tpu.memref_slice %arg2[%19, %c0_i32_37] : memref<256x128xf32, #tpu.memory_space<any>> -> memref<1x128xf32, #tpu.memory_space<any>>
    %c3_i32_38 = arith.constant 3 : i32
    %c0_i32_39 = arith.constant 0 : i32
    %61 = tpu.memref_slice %arg5[%c3_i32_38, %c0_i32_39] : memref<8x128xf32, #tpu.memory_space<vmem>> -> memref<1x128xf32, #tpu.memory_space<vmem>>
    %62 = tpu.memref_slice %arg6[%c3_i32_36] : memref<8x!tpu.dma_semaphore, #tpu.memory_space<semaphore_mem>> -> memref<1x!tpu.dma_semaphore, #tpu.memory_space<semaphore_mem>>
    %63 = tpu.memref_squeeze %62 : memref<1x!tpu.dma_semaphore, #tpu.memory_space<semaphore_mem>> -> memref<!tpu.dma_semaphore, #tpu.memory_space<semaphore_mem>>
    tpu.wait_dma2 semaphore(%63 : memref<!tpu.dma_semaphore, #tpu.memory_space<semaphore_mem>>) src(%60 : memref<1x128xf32, #tpu.memory_space<any>>) dst(%61 : memref<1x128xf32, #tpu.memory_space<vmem>>)
    %c4_i32_40 = arith.constant 4 : i32
    %c0_i32_41 = arith.constant 0 : i32
    %64 = tpu.memref_slice %arg2[%25, %c0_i32_41] : memref<256x128xf32, #tpu.memory_space<any>> -> memref<1x128xf32, #tpu.memory_space<any>>
    %c4_i32_42 = arith.constant 4 : i32
    %c0_i32_43 = arith.constant 0 : i32
    %65 = tpu.memref_slice %arg5[%c4_i32_42, %c0_i32_43] : memref<8x128xf32, #tpu.memory_space<vmem>> -> memref<1x128xf32, #tpu.memory_space<vmem>>
    %66 = tpu.memref_slice %arg6[%c4_i32_40] : memref<8x!tpu.dma_semaphore, #tpu.memory_space<semaphore_mem>> -> memref<1x!tpu.dma_semaphore, #tpu.memory_space<semaphore_mem>>
    %67 = tpu.memref_squeeze %66 : memref<1x!tpu.dma_semaphore, #tpu.memory_space<semaphore_mem>> -> memref<!tpu.dma_semaphore, #tpu.memory_space<semaphore_mem>>
    tpu.wait_dma2 semaphore(%67 : memref<!tpu.dma_semaphore, #tpu.memory_space<semaphore_mem>>) src(%64 : memref<1x128xf32, #tpu.memory_space<any>>) dst(%65 : memref<1x128xf32, #tpu.memory_space<vmem>>)
    %c5_i32_44 = arith.constant 5 : i32
    %c0_i32_45 = arith.constant 0 : i32
    %68 = tpu.memref_slice %arg2[%31, %c0_i32_45] : memref<256x128xf32, #tpu.memory_space<any>> -> memref<1x128xf32, #tpu.memory_space<any>>
    %c5_i32_46 = arith.constant 5 : i32
    %c0_i32_47 = arith.constant 0 : i32
    %69 = tpu.memref_slice %arg5[%c5_i32_46, %c0_i32_47] : memref<8x128xf32, #tpu.memory_space<vmem>> -> memref<1x128xf32, #tpu.memory_space<vmem>>
    %70 = tpu.memref_slice %arg6[%c5_i32_44] : memref<8x!tpu.dma_semaphore, #tpu.memory_space<semaphore_mem>> -> memref<1x!tpu.dma_semaphore, #tpu.memory_space<semaphore_mem>>
    %71 = tpu.memref_squeeze %70 : memref<1x!tpu.dma_semaphore, #tpu.memory_space<semaphore_mem>> -> memref<!tpu.dma_semaphore, #tpu.memory_space<semaphore_mem>>
    tpu.wait_dma2 semaphore(%71 : memref<!tpu.dma_semaphore, #tpu.memory_space<semaphore_mem>>) src(%68 : memref<1x128xf32, #tpu.memory_space<any>>) dst(%69 : memref<1x128xf32, #tpu.memory_space<vmem>>)
    %c6_i32_48 = arith.constant 6 : i32
    %c0_i32_49 = arith.constant 0 : i32
    %72 = tpu.memref_slice %arg2[%37, %c0_i32_49] : memref<256x128xf32, #tpu.memory_space<any>> -> memref<1x128xf32, #tpu.memory_space<any>>
    %c6_i32_50 = arith.constant 6 : i32
    %c0_i32_51 = arith.constant 0 : i32
    %73 = tpu.memref_slice %arg5[%c6_i32_50, %c0_i32_51] : memref<8x128xf32, #tpu.memory_space<vmem>> -> memref<1x128xf32, #tpu.memory_space<vmem>>
    %74 = tpu.memref_slice %arg6[%c6_i32_48] : memref<8x!tpu.dma_semaphore, #tpu.memory_space<semaphore_mem>> -> memref<1x!tpu.dma_semaphore, #tpu.memory_space<semaphore_mem>>
    %75 = tpu.memref_squeeze %74 : memref<1x!tpu.dma_semaphore, #tpu.memory_space<semaphore_mem>> -> memref<!tpu.dma_semaphore, #tpu.memory_space<semaphore_mem>>
    tpu.wait_dma2 semaphore(%75 : memref<!tpu.dma_semaphore, #tpu.memory_space<semaphore_mem>>) src(%72 : memref<1x128xf32, #tpu.memory_space<any>>) dst(%73 : memref<1x128xf32, #tpu.memory_space<vmem>>)
    %c7_i32_52 = arith.constant 7 : i32
    %c0_i32_53 = arith.constant 0 : i32
    %76 = tpu.memref_slice %arg2[%43, %c0_i32_53] : memref<256x128xf32, #tpu.memory_space<any>> -> memref<1x128xf32, #tpu.memory_space<any>>
    %c7_i32_54 = arith.constant 7 : i32
    %c0_i32_55 = arith.constant 0 : i32
    %77 = tpu.memref_slice %arg5[%c7_i32_54, %c0_i32_55] : memref<8x128xf32, #tpu.memory_space<vmem>> -> memref<1x128xf32, #tpu.memory_space<vmem>>
    %78 = tpu.memref_slice %arg6[%c7_i32_52] : memref<8x!tpu.dma_semaphore, #tpu.memory_space<semaphore_mem>> -> memref<1x!tpu.dma_semaphore, #tpu.memory_space<semaphore_mem>>
    %79 = tpu.memref_squeeze %78 : memref<1x!tpu.dma_semaphore, #tpu.memory_space<semaphore_mem>> -> memref<!tpu.dma_semaphore, #tpu.memory_space<semaphore_mem>>
    tpu.wait_dma2 semaphore(%79 : memref<!tpu.dma_semaphore, #tpu.memory_space<semaphore_mem>>) src(%76 : memref<1x128xf32, #tpu.memory_space<any>>) dst(%77 : memref<1x128xf32, #tpu.memory_space<vmem>>)
    %c0_56 = arith.constant 0 : index
    %c0_57 = arith.constant 0 : index
    %80 = vector.load %arg5[%c0_56, %c0_57] : memref<8x128xf32, #tpu.memory_space<vmem>>, vector<8x128xf32>
    %c0_58 = arith.constant 0 : index
    %c0_59 = arith.constant 0 : index
    %81 = vector.load %arg3[%c0_58, %c0_59] : memref<8x128xf32, #tpu.memory_space<vmem>>, vector<8x128xf32>
    %82 = arith.addf %80, %81 : vector<8x128xf32>
    %c0_60 = arith.constant 0 : index
    %c0_61 = arith.constant 0 : index
    %c0_62 = arith.constant 0 : index
    %83 = vector.load %arg4[%c0_60, %c0_61, %c0_62] : memref<1x8x128xf32, #tpu.memory_space<vmem>>, vector<1x8x128xf32>
    %84 = vector.shape_cast %83 : vector<1x8x128xf32> to vector<8x128xf32>
    %85 = vector.shape_cast %82 : vector<8x128xf32> to vector<1x8x128xf32>
    tpu.vector_store %arg4[%c0_60, %c0_61, %c0_62], %85 {strides = array<i32>} : memref<1x8x128xf32, #tpu.memory_space<vmem>>, vector<1x8x128xf32>,
    return
  }
  func.func @transform_1(%arg0: i32, %arg1: memref<2x8xi32, #tpu.memory_space<smem>>) -> (i32, i32) {
    %c0_i32 = arith.constant 0 : i32
    %c0_i32_0 = arith.constant 0 : i32
    %c0_i32_1 = arith.constant 0 : i32
    return %c0_i32, %c0_i32_0 : i32, i32
  }
  func.func @transform_2(%arg0: i32, %arg1: memref<2x8xi32, #tpu.memory_space<smem>>) -> (i32, i32, i32) {
    %c0_i32 = arith.constant 0 : i32
    %c0_i32_0 = arith.constant 0 : i32
    %c0_i32_1 = arith.constant 0 : i32
    return %arg0, %c0_i32, %c0_i32_0 : i32, i32, i32
  }
}

</mosaic_0001>

<bundles_post_ra>
// kernel: tpu_custom_call.1
= control target key start
LH: loop header
LB: loop body
LE: loop exit
PB: predicated region body
PF: predicated region fallthrough
CT: control target
= control target key end

     0   :  { %s1122_s0 = inlined_call_operand.hbm [shape: s32[2,8], index: 0, kind: input, shape index: {}]   ;;  %s1123_s1 = inlined_call_operand.hbm [shape: f32[256,128], index: 1, kind: input, shape index: {}]   ;;  %s1124_s2 = inlined_call_operand.hbm [shape: f32[8,128], index: 2, kind: input, shape index: {}]   ;;  %s1125_s3 = inlined_call_operand.hbm [shape: f32[2,8,128], index: 3, kind: output, shape index: {}]  }
   0x1   :  { %1130 = sst [smem:[#allocation39_spill]] %s1124_s2  ;;  %s499_s14 = scalar_lea.hbm %s1122_s0, 32 }
   0x2   :  { %p500_p0 = scmp.ne.s32.totalorder %s1122_s0, %s499_s14  ;;  %p503_p1 = scmp.lt.u32.totalorder %s499_s14, %s1122_s0 }
   0x4   :  { %p505_p2 = pnand %p503_p1, %p500_p0 }
   0x6   :  { %508 = shalt.err (!%p505_p2)  }
   0x7   :  { %s815_s19 = smov [#allocation5]  }
   0x8   :  { %9 = dma.hbm_to_smem %s1122_s0, 32, %s815_s19, [#allocation4] }
   0x9   :  { %773 = dma.done.wait [#allocation4], 32 }
   0xa   :  { %774 = vsyncadd [#allocation4], 4294967264 }
   0xb   :  { %11 = sfence }
   0xc   :  { %12 = vsyncpa [#allocation7], 0 }
   0xd   :  { %13 = vsyncpa [#allocation8], 0 }
   0xe   :  { %15 = vsyncpa [#allocation8 + $0x1], 0  ;;  %s858_s22 = smov 0   ;;  %s860_s23 = smov 0  }
   0xf   :  { %s862_s24 = smov 0   ;;  %s864_s25 = smov 0  }
  0x10 LB: > { %s879_s0 = sadd.s32 4294967295, %s813_s25   ;;  %s413_s26 = sadd.s32 4294967294, %s813_s25   ;;  %s813_s25 = sphi %s864_s25, %s1145_s25   ;;  %s809_s24 = sphi %s862_s24, %s1144_s24   ;;  %s805_s23 = sphi %s860_s23, %s1143_s23   ;;  %s801_s22 = sphi %s858_s22, %s1142_s22  }
  0x11   : > { %s883_s27 = sadd.s32 1, %s813_s25   ;;  %s49_s28 = sadd.s32 1, %s809_s24 }
  0x12   : > { %s46_s29 = ssub.s32 %s813_s25, %s883_s27  ;;  %p59_p3 = scmp.ne.s32.totalorder %s809_s24, %s805_s23 }
  0x13   : > { %p47_p4 = scmp.eq.s32.totalorder %s46_s29, 0  ;;  %p60_p5 = scmp.eq.s32.totalorder %s879_s0, 1 }
  0x14   : > { %p65_p6 = scmp.ne.s32.totalorder %s805_s23, %s801_s22  ;;  %p66_p7 = scmp.eq.s32.totalorder %s413_s26, 1 }
  0x15   : > { %s894_s30 = scalar_select %p47_p4, %s809_s24, %s49_s28  }
  0x16   : > { %p896_p8 = por %p60_p5, %p59_p3  ;;  %p900_p9 = por %p66_p7, %p65_p6 }
  0x17   : > { %p414_p10 = scmp.ge.s32.totalorder %s813_s25, 1  ;;  %p73_p11 = scmp.lt.s32.totalorder %s813_s25, 3 }
  0x18   : > { %s1131_s4 = scalar_select %p896_p8, 1, 0 }
  0x19   : > { %s1132_s5 = scalar_select %p900_p9, 1, 0 }
  0x1a   : > { %p1126_p12 = scmp.eq.s32.totalorder %s879_s0, 0  ;;  %p907_p13 = pnand %p414_p10, %p73_p11 }
  0x1b   : > { %s816_s7 = smov [#allocation6]   ;;  %s1135_s2 = sld [smem:[#allocation39_spill]] }
  0x1c   : > { %s1133_s6 = scalar_select %p907_p13, 1, 0 }
  0x1d   : > { %s86_s8 = sshll.u32 %s816_s7, 4  ;;  %p446_p0 = pneg %p907_p13  ;;  %s87_s8 = int_to_ptr.vmem [resolvable:$true] %s86_s8 }
  0x1f   : > { %p915_p1 = pnand %p1126_p12, %p446_p0 }
  0x21   : > { %s509_s12 = scalar_lea.hbm %s1135_s2, 128  ;;  %p511_p3 = pneg %p915_p1 }
  0x22   : > { %p510_p2 = scmp.ne.s32.totalorder %s1135_s2, %s509_s12  ;;  %p516_p6 = scmp.lt.u32.totalorder %s509_s12, %s1135_s2 }
  0x24   : > { %p512_p4 = pnand %p511_p3, %p510_p2 }
  0x26   : > { %p513_p5 = pneg %p512_p4 }
  0x28   : > { %p518_p7 = pnand %p516_p6, %p513_p5 }
  0x2a   : > { %521 = shalt.err (!%p518_p7)
}
  0x2b   : > { %s522_s17 = scalar_lea.vmem %s87_s8, 128  ;;  %p530_p12 = scmp.lt.s32.totalorder %s87_s8, %s87_s8 }
  0x2c   : > { %p523_p10 = scmp.ne.s32.totalorder %s87_s8, %s522_s17  ;;  %p531_p9 = scmp.lt.s32.totalorder %s522_s17, %s522_s17 }
  0x2e   : > { %p525_p11 = pnand %p523_p10, %p511_p3  ;;  %p532_p8 = por %p531_p9, %p530_p12 }
  0x30   : > { %p526_p0 = pneg %p525_p11 }
  0x32   : > { %p533_p13 = pnand %p532_p8, %p526_p0 }
  0x34   : > { %536 = shalt.err (!%p533_p13)
}
  0x35   : > { %449 = dma.hbm_to_vmem [thread:$0]  (!%p915_p1), %s1135_s2, 128, %s87_s8, [#allocation7]  }
  0x36   : > { %p1136_p2 = scmp.ne.s32.totalorder %s1133_s6, 0 }
  0x37   : > { %p1137_p4 = scmp.eq.s32.totalorder (!%p1136_p2), %s879_s0, 0 }
  0x38   : > { %99 = sbr.rel (%p1136_p2) target bundleno = 286 (0x11e), region = 24 }
  0x3f   : > { %776 = dma.done.wait (%p1137_p4), [#allocation7], 128   ;;  %p1138_p3 = pmov %p1137_p4 }
  0x40   : > { %s1129_s20 = sand.u32 1, %s805_s23   ;;  %s943_s21 = sshll.u32 %s879_s0, 7 }
  0x41   : > { %778 = vsyncadd (%p1138_p3), [#allocation7], 4294967168  ;;  %s947_s26 = sshll.u32 %s1129_s20, 3  ;;  %s115_s28 = sld [smem:[#allocation5 + %s943_s21]] }
  0x42   : > { %s817_s29 = smov [#allocation2]   ;;  %s129_s7 = sadd.s32 1, %s943_s21 }
  0x43   : > { %s125_s6 = sshll.u32 %s817_s29, 4  ;;  %s953_s8 = sld [smem:[#allocation5 + %s129_s7]]  ;;  %s951_s6 = int_to_ptr.vmem [resolvable:$true] %s125_s6 }
  0x44   : > { %s146_s9 = sadd.s32 2, %s943_s21  ;;  %s818_s10 = smov [#allocation2 + $0x1]  }
  0x45   : > { %s142_s11 = sshll.u32 %s818_s10, 4  ;;  %s956_s12 = sld [smem:[#allocation5 + %s146_s9]]  ;;  %s958_s11 = int_to_ptr.vmem [resolvable:$true] %s142_s11 }
  0x46   : > { %s966_s19 = scalar_lea.hbm %s1123_s1, 4096 }
  0x47   : > { %s420_s0 = sshll.u32 %s115_s28, 4 }
  0x48   : > { %s117_s15 = scalar_lea.hbm %s1123_s1, %s420_s0 }
  0x49   : > { %s537_s16 = scalar_lea.hbm %s117_s15, 16  ;;  %p540_p9 = scmp.lt.u32.totalorder %s117_s15, %s1123_s1 }
  0x4a   : > { %p538_p8 = scmp.ne.s32.totalorder %s117_s15, %s537_s16  ;;  %p541_p12 = scmp.lt.u32.totalorder %s966_s19, %s537_s16 }
  0x4b   : > { %p543_p1 = scmp.lt.u32.totalorder %s537_s16, %s117_s15 }
  0x4c   : > { %p542_p13 = por %p541_p12, %p540_p9 }
  0x4e   : > { %p544_p5 = por %p543_p1, %p542_p13 }
  0x50   : > { %p545_p6 = pnand %p544_p5, %p538_p8 }
  0x52   : > { %548 = shalt.err (!%p545_p6)  }
  0x53   : > { %s549_s28 = scalar_lea.vmem %s951_s6, 16  ;;  %s975_s9 = scalar_lea.vmem %s951_s6, 128 }
  0x54   : > { %p550_p7 = scmp.ne.s32.totalorder %s951_s6, %s549_s28  ;;  %p554_p10 = scmp.lt.s32.totalorder %s951_s6, %s951_s6 }
  0x55   : > { %p555_p11 = scmp.lt.s32.totalorder %s975_s9, %s549_s28 }
  0x57   : > { %p556_p0 = por %p555_p11, %p554_p10 }
  0x59   : > { %p557_p2 = pnand %p556_p0, %p550_p7 }
  0x5b   : > { %560 = shalt.err (!%p557_p2)  }
  0x5c   : > { %128 = dma.hbm_to_vmem [thread:$0]  %s117_s15, 16, %s951_s6, [#allocation3] }
  0x5d   : > { %s421_s10 = sshll.u32 %s953_s8, 4  ;;  %s819_s0 = smov [#allocation2 + $0x2]  }
  0x5e   : > { %s159_s13 = sshll.u32 %s819_s0, 4  ;;  %s132_s17 = scalar_lea.hbm %s1123_s1, %s421_s10  ;;  %s985_s13 = int_to_ptr.vmem [resolvable:$true] %s159_s13 }
  0x5f   : > { %s561_s18 = scalar_lea.hbm %s132_s17, 16  ;;  %p564_p3 = scmp.lt.u32.totalorder %s132_s17, %s1123_s1 }
  0x60   : > { %p562_p4 = scmp.ne.s32.totalorder %s132_s17, %s561_s18  ;;  %p565_p8 = scmp.lt.u32.totalorder %s966_s19, %s561_s18 }
  0x61   : > { %p567_p12 = scmp.lt.u32.totalorder %s561_s18, %s132_s17 }
  0x62   : > { %p566_p9 = por %p565_p8, %p564_p3 }
  0x64   : > { %p568_p13 = por %p567_p12, %p566_p9 }
  0x66   : > { %p569_p1 = pnand %p568_p13, %p562_p4 }
  0x68   : > { %572 = shalt.err (!%p569_p1)  }
  0x69   : > { %s573_s8 = scalar_lea.vmem %s958_s11, 16  ;;  %p578_p6 = scmp.lt.s32.totalorder %s958_s11, %s951_s6 }
  0x6a   : > { %p574_p5 = scmp.ne.s32.totalorder %s958_s11, %s573_s8  ;;  %p579_p7 = scmp.lt.s32.totalorder %s975_s9, %s573_s8 }
  0x6c   : > { %p580_p10 = por %p579_p7, %p578_p6 }
  0x6e   : > { %p581_p11 = pnand %p580_p10, %p574_p5 }
  0x70   : > { %584 = shalt.err (!%p581_p11)  }
  0x71   : > { %145 = dma.hbm_to_vmem [thread:$0]  %s132_s17, 16, %s958_s11, [#allocation3 + $0x1] }
  0x72   : > { %s422_s15 = sshll.u32 %s956_s12, 4  ;;  %s163_s28 = sadd.s32 3, %s943_s21 }
  0x73   : > { %s149_s14 = scalar_lea.hbm %s1123_s1, %s422_s15  ;;  %s1002_s16 = sld [smem:[#allocation5 + %s163_s28]] }
  0x74   : > { %s585_s18 = scalar_lea.hbm %s149_s14, 16  ;;  %p588_p2 = scmp.lt.u32.totalorder %s149_s14, %s1123_s1 }
  0x75   : > { %p586_p0 = scmp.ne.s32.totalorder %s149_s14, %s585_s18  ;;  %p589_p4 = scmp.lt.u32.totalorder %s966_s19, %s585_s18 }
  0x76   : > { %p591_p8 = scmp.lt.u32.totalorder %s585_s18, %s149_s14 }
  0x77   : > { %p590_p3 = por %p589_p4, %p588_p2 }
  0x79   : > { %p592_p9 = por %p591_p8, %p590_p3 }
  0x7b   : > { %p593_p12 = pnand %p592_p9, %p586_p0 }
  0x7d   : > { %596 = shalt.err (!%p593_p12)  }
  0x7e   : > { %s597_s11 = scalar_lea.vmem %s985_s13, 16  ;;  %p602_p1 = scmp.lt.s32.totalorder %s985_s13, %s951_s6 }
  0x7f   : > { %p598_p13 = scmp.ne.s32.totalorder %s985_s13, %s597_s11  ;;  %p603_p5 = scmp.lt.s32.totalorder %s975_s9, %s597_s11 }
  0x81   : > { %p604_p6 = por %p603_p5, %p602_p1 }
  0x83   : > { %p605_p7 = pnand %p604_p6, %p598_p13 }
  0x85   : > { %608 = shalt.err (!%p605_p7)  }
  0x86   : > { %162 = dma.hbm_to_vmem [thread:$0]  %s149_s14, 16, %s985_s13, [#allocation3 + $0x2] }
  0x87   : > { %s180_s12 = sadd.s32 4, %s943_s21  ;;  %s820_s17 = smov [#allocation2 + $0x3]  }
  0x88   : > { %s176_s8 = sshll.u32 %s820_s17, 4  ;;  %s181_s15 = sld [smem:[#allocation5 + %s180_s12]]  ;;  %s177_s8 = int_to_ptr.vmem [resolvable:$true] %s176_s8 }
  0x89   : > { %s821_s28 = smov [#allocation2 + $0x4]   ;;  %s197_s0 = sadd.s32 5, %s943_s21 }
  0x8a   : > { %s193_s10 = sshll.u32 %s821_s28, 4  ;;  %s423_s18 = sshll.u32 %s1002_s16, 4  ;;  %s1017_s10 = int_to_ptr.vmem [resolvable:$true] %s193_s10 }
  0x8b   : > { %s166_s11 = scalar_lea.hbm %s1123_s1, %s423_s18  ;;  %s1022_s20 = sld [smem:[#allocation5 + %s197_s0]] }
  0x8c   : > { %s609_s2 = scalar_lea.hbm %s166_s11, 16  ;;  %p612_p11 = scmp.lt.u32.totalorder %s166_s11, %s1123_s1 }
  0x8d   : > { %p610_p10 = scmp.ne.s32.totalorder %s166_s11, %s609_s2  ;;  %p613_p0 = scmp.lt.u32.totalorder %s966_s19, %s609_s2 }
  0x8e   : > { %p615_p4 = scmp.lt.u32.totalorder %s609_s2, %s166_s11 }
  0x8f   : > { %p614_p2 = por %p613_p0, %p612_p11 }
  0x91   : > { %p616_p3 = por %p615_p4, %p614_p2 }
  0x93   : > { %p617_p8 = pnand %p616_p3, %p610_p10 }
  0x95   : > { %620 = shalt.err (!%p617_p8)  }
  0x96   : > { %s621_s16 = scalar_lea.vmem %s177_s8, 16  ;;  %p626_p12 = scmp.lt.s32.totalorder %s177_s8, %s951_s6 }
  0x97   : > { %p622_p9 = scmp.ne.s32.totalorder %s177_s8, %s621_s16  ;;  %p627_p13 = scmp.lt.s32.totalorder %s975_s9, %s621_s16 }
  0x99   : > { %p628_p1 = por %p627_p13, %p626_p12 }
  0x9b   : > { %p629_p5 = pnand %p628_p1, %p622_p9 }
  0x9d   : > { %632 = shalt.err (!%p629_p5)  }
  0x9e   : > { %179 = dma.hbm_to_vmem [thread:$0]  %s166_s11, 16, %s177_s8, [#allocation3 + $0x3] }
  0x9f   : > { %s424_s12 = sshll.u32 %s181_s15, 4  ;;  %s822_s2 = smov [#allocation2 + $0x5]  }
  0xa0   : > { %s183_s0 = scalar_lea.hbm %s1123_s1, %s424_s12  ;;  %s210_s18 = sshll.u32 %s822_s2, 4  ;;  %s211_s18 = int_to_ptr.vmem [resolvable:$true] %s210_s18 }
  0xa1   : > { %s633_s29 = scalar_lea.hbm %s183_s0, 16  ;;  %p636_p7 = scmp.lt.u32.totalorder %s183_s0, %s1123_s1 }
  0xa2   : > { %p634_p6 = scmp.ne.s32.totalorder %s183_s0, %s633_s29  ;;  %p637_p10 = scmp.lt.u32.totalorder %s966_s19, %s633_s29 }
  0xa3   : > { %p639_p0 = scmp.lt.u32.totalorder %s633_s29, %s183_s0 }
  0xa4   : > { %p638_p11 = por %p637_p10, %p636_p7 }
  0xa6   : > { %p640_p2 = por %p639_p0, %p638_p11 }
  0xa8   : > { %p641_p4 = pnand %p640_p2, %p634_p6 }
  0xaa   : > { %644 = shalt.err (!%p641_p4)  }
  0xab   : > { %s645_s8 = scalar_lea.vmem %s1017_s10, 16  ;;  %p650_p8 = scmp.lt.s32.totalorder %s1017_s10, %s951_s6 }
  0xac   : > { %p646_p3 = scmp.ne.s32.totalorder %s1017_s10, %s645_s8  ;;  %p651_p9 = scmp.lt.s32.totalorder %s975_s9, %s645_s8 }
  0xae   : > { %p652_p12 = por %p651_p9, %p650_p8 }
  0xb0   : > { %p653_p13 = pnand %p652_p12, %p646_p3 }
  0xb2   : > { %656 = shalt.err (!%p653_p13)  }
  0xb3   : > { %196 = dma.hbm_to_vmem [thread:$0]  %s183_s0, 16, %s1017_s10, [#allocation3 + $0x4] }
  0xb4   : > { %s214_s15 = sadd.s32 6, %s943_s21  ;;  %s425_s11 = sshll.u32 %s1022_s20, 4 }
  0xb5   : > { %s215_s14 = sld [smem:[#allocation5 + %s214_s15]]  ;;  %s200_s17 = scalar_lea.hbm %s1123_s1, %s425_s11 }
  0xb6   : > { %s657_s28 = scalar_lea.hbm %s200_s17, 16  ;;  %p660_p5 = scmp.lt.u32.totalorder %s200_s17, %s1123_s1 }
  0xb7   : > { %p658_p1 = scmp.ne.s32.totalorder %s200_s17, %s657_s28  ;;  %p661_p6 = scmp.lt.u32.totalorder %s966_s19, %s657_s28 }
  0xb8   : > { %p663_p10 = scmp.lt.u32.totalorder %s657_s28, %s200_s17 }
  0xb9   : > { %p662_p7 = por %p661_p6, %p660_p5 }
  0xbb   : > { %p664_p11 = por %p663_p10, %p662_p7 }
  0xbd   : > { %p665_p0 = pnand %p664_p11, %p658_p1 }
  0xbf   : > { %668 = shalt.err (!%p665_p0)  }
  0xc0   : > { %s669_s10 = scalar_lea.vmem %s211_s18, 16  ;;  %p674_p4 = scmp.lt.s32.totalorder %s211_s18, %s951_s6 }
  0xc1   : > { %p670_p2 = scmp.ne.s32.totalorder %s211_s18, %s669_s10  ;;  %p675_p3 = scmp.lt.s32.totalorder %s975_s9, %s669_s10 }
  0xc3   : > { %p676_p8 = por %p675_p3, %p674_p4 }
  0xc5   : > { %p677_p9 = pnand %p676_p8, %p670_p2 }
  0xc7   : > { %680 = shalt.err (!%p677_p9)  }
  0xc8   : > { %213 = dma.hbm_to_vmem [thread:$0]  %s200_s17, 16, %s211_s18, [#allocation3 + $0x5] }
  0xc9   : > { %s823_s20 = smov [#allocation2 + $0x6]   ;;  %s231_s7 = sadd.s32 7, %s943_s21 }
  0xca   : > { %s227_s0 = sshll.u32 %s823_s20, 4  ;;  %s232_s13 = sld [smem:[#allocation5 + %s231_s7]]  ;;  %s228_s0 = int_to_ptr.vmem [resolvable:$true] %s227_s0 }
  0xcb   : > { %s426_s8 = sshll.u32 %s215_s14, 4  ;;  %s824_s15 = smov [#allocation2 + $0x7]  }
  0xcc   : > { %s244_s11 = sshll.u32 %s824_s15, 4  ;;  %s217_s28 = scalar_lea.hbm %s1123_s1, %s426_s8  ;;  %s245_s11 = int_to_ptr.vmem [resolvable:$true] %s244_s11 }
  0xcd   : > { %s681_s2 = scalar_lea.hbm %s217_s28, 16  ;;  %p684_p13 = scmp.lt.u32.totalorder %s217_s28, %s1123_s1 }
  0xce   : > { %p682_p12 = scmp.ne.s32.totalorder %s217_s28, %s681_s2  ;;  %p685_p1 = scmp.lt.u32.totalorder %s966_s19, %s681_s2 }
  0xcf   : > { %p687_p6 = scmp.lt.u32.totalorder %s681_s2, %s217_s28 }
  0xd0   : > { %p686_p5 = por %p685_p1, %p684_p13 }
  0xd2   : > { %p688_p7 = por %p687_p6, %p686_p5 }
  0xd4   : > { %p689_p10 = pnand %p688_p7, %p682_p12 }
  0xd6   : > { %692 = shalt.err (!%p689_p10)  }
  0xd7   : > { %s693_s18 = scalar_lea.vmem %s228_s0, 16  ;;  %p698_p0 = scmp.lt.s32.totalorder %s228_s0, %s951_s6 }
  0xd8   : > { %p694_p11 = scmp.ne.s32.totalorder %s228_s0, %s693_s18  ;;  %p699_p2 = scmp.lt.s32.totalorder %s975_s9, %s693_s18 }
  0xda   : > { %p700_p4 = por %p699_p2, %p698_p0 }
  0xdc   : > { %p701_p3 = pnand %p700_p4, %p694_p11 }
  0xde   : > { %704 = shalt.err (!%p701_p3)  }
  0xdf   : > { %230 = dma.hbm_to_vmem [thread:$0]  %s217_s28, 16, %s228_s0, [#allocation3 + $0x6] }
  0xe0   : > { %s427_s14 = sshll.u32 %s232_s13, 4 }
  0xe1   : > { %s234_s7 = scalar_lea.hbm %s1123_s1, %s427_s14 }
  0xe2   : > { %s705_s8 = scalar_lea.hbm %s234_s7, 16  ;;  %p708_p9 = scmp.lt.u32.totalorder %s234_s7, %s1123_s1 }
  0xe3   : > { %p706_p8 = scmp.ne.s32.totalorder %s234_s7, %s705_s8  ;;  %p709_p12 = scmp.lt.u32.totalorder %s966_s19, %s705_s8 }
  0xe4   : > { %p711_p1 = scmp.lt.u32.totalorder %s705_s8, %s234_s7 }
  0xe5   : > { %p710_p13 = por %p709_p12, %p708_p9 }
  0xe7   : > { %p712_p5 = por %p711_p1, %p710_p13 }
  0xe9   : > { %p713_p6 = pnand %p712_p5, %p706_p8 }
  0xeb   : > { %716 = shalt.err (!%p713_p6)  }
  0xec   : > { %s717_s0 = scalar_lea.vmem %s245_s11, 16  ;;  %p722_p10 = scmp.lt.s32.totalorder %s245_s11, %s951_s6 }
  0xed   : > { %p718_p7 = scmp.ne.s32.totalorder %s245_s11, %s717_s0  ;;  %p723_p11 = scmp.lt.s32.totalorder %s975_s9, %s717_s0 }
  0xef   : > { %p724_p0 = por %p723_p11, %p722_p10 }
  0xf1   : > { %p725_p2 = pnand %p724_p0, %p718_p7 }
  0xf3   : > { %728 = shalt.err (!%p725_p2)  }
  0xf4   : > { %247 = dma.hbm_to_vmem [thread:$0]  %s234_s7, 16, %s245_s11, [#allocation3 + $0x7] }
  0xf5   : > { %s113_s13 = scalar_lea.vmem [#allocation9], %s947_s26 }
  0xf6   : > { %779 = dma.done.wait [#allocation3], 16 }
  0xf7   : > { %780 = vsyncadd [#allocation3], 4294967280 }
  0xf8   : > { %781 = dma.done.wait [#allocation3 + $0x1], 16 }
  0xf9   : > { %782 = vsyncadd [#allocation3 + $0x1], 4294967280 }
  0xfa   : > { %783 = dma.done.wait [#allocation3 + $0x2], 16 }
  0xfb   : > { %784 = vsyncadd [#allocation3 + $0x2], 4294967280 }
  0xfc   : > { %785 = dma.done.wait [#allocation3 + $0x3], 16 }
  0xfd   : > { %786 = vsyncadd [#allocation3 + $0x3], 4294967280 }
  0xfe   : > { %787 = dma.done.wait [#allocation3 + $0x4], 16 }
  0xff   : > { %788 = vsyncadd [#allocation3 + $0x4], 4294967280 }
 0x100   : > { %789 = dma.done.wait [#allocation3 + $0x5], 16 }
 0x101   : > { %790 = vsyncadd [#allocation3 + $0x5], 4294967280 }
 0x102   : > { %791 = dma.done.wait [#allocation3 + $0x6], 16 }
 0x103   : > { %792 = vsyncadd [#allocation3 + $0x6], 4294967280 }
 0x104   : > { %793 = dma.done.wait [#allocation3 + $0x7], 16 }
 0x105   : > { %794 = vsyncadd [#allocation3 + $0x7], 4294967280  ;;  %s283_s26 = sshll.u32 %s113_s13, 4  ;;  %v265_v0 = vld [vmem:[#allocation2] sm:$0xff]  ;;  %v266_v1 = vld [vmem:[#allocation6] sm:$0xff]  ;;  %s1078_s9 = scalar_lea.hbm %s1125_s3, %s943_s21  ;;  %s1080_s26 = int_to_ptr.vmem [resolvable:$true] %s283_s26 }
 0x106   : > { %v267_v2 = vadd.f32 %v266_v1, %v265_v0  ;;  %s1139_s11 = sand.u32 1, %s805_s23   ;;  %s729_s28 = scalar_lea.vmem %s1080_s26, 128 }
 0x107   : > { %s270_s12 = scalar_lea.sflag [#allocation8], %s1139_s11  ;;  %p730_p4 = scmp.ne.s32.totalorder %s1080_s26, %s729_s28 }
 0x108   : > { %268 = vst [vmem:[%s113_s13] sm:$0xff] %v267_v2  ;;  %p1140_p3 = scmp.ne.s32.totalorder %s1131_s4, 0  ;;  %s825_s2 = smov [#allocation9]  }
 0x109   : > { %s733_s29 = sshll.u32 %s825_s2, 4  ;;  %s734_s29 = int_to_ptr.vmem [resolvable:$false] %s733_s29 }
 0x10a   : > { %p731_p8 = pnand %p730_p4, %p1140_p3  ;;  %s735_s10 = scalar_lea.vmem %s734_s29, 256 }
 0x10b   : > { %p736_p12 = scmp.lt.s32.totalorder %s1080_s26, %s734_s29  ;;  %p737_p13 = scmp.lt.s32.totalorder %s735_s10, %s729_s28 }
 0x10c   : > { %p732_p9 = pneg %p731_p8 }
 0x10d   : > { %p738_p1 = por %p737_p13, %p736_p12 }
 0x10f   : > { %p739_p5 = pnand %p738_p1, %p732_p9 }
 0x111   : > { %742 = shalt.err (!%p739_p5)
}
 0x112   : > { %s743_s21 = scalar_lea.hbm %s1078_s9, 128  ;;  %s747_s17 = scalar_lea.hbm %s1125_s3, 256 }
 0x113   : > { %p744_p6 = scmp.ne.s32.totalorder %s1078_s9, %s743_s21  ;;  %p748_p11 = scmp.lt.u32.totalorder %s1078_s9, %s1125_s3 }
 0x114   : > { %p749_p0 = scmp.lt.u32.totalorder %s747_s17, %s743_s21  ;;  %p751_p4 = scmp.lt.u32.totalorder %s743_s21, %s1078_s9 }
 0x115   : > { %p745_p7 = pnand %p744_p6, %p1140_p3 }
 0x116   : > { %p750_p2 = por %p749_p0, %p748_p11 }
 0x117   : > { %p746_p10 = pneg %p745_p7 }
 0x118   : > { %p752_p8 = por %p751_p4, %p750_p2 }
 0x11a   : > { %p753_p9 = pnand %p752_p8, %p746_p10 }
 0x11c   : > { %756 = shalt.err (!%p753_p9)
}
 0x11d   : > { %444 = dma.vmem_to_hbm [thread:$0]  (%p1140_p3), %s1080_s26, 128, %s1078_s9, %s270_s12  }
 0x11e PF: > { %p456_p12 = scmp.ge.s32.totalorder %s813_s25, 2  ;;  %s295_s8 = sand.u32 1, %s801_s22  }
 0x11f   : > { %p1141_p13 = scmp.ne.s32.totalorder %s1132_s5, 0  ;;  %s296_s15 = scalar_lea.sflag [#allocation8], %s295_s8 }
 0x121   : > { %p451_p1 = pnand %p456_p12, %p1141_p13 }
 0x123   : > { %796 = dma.done.wait (!%p451_p1), %s296_s15, 128  }
 0x124   : > { %798 = vsyncadd (!%p451_p1), %s296_s15, 4294967168  ;;  %p18_p5 = scmp.ge.s32.totalorder %s883_s27, 4   ;;  %s1142_s22 = smov %s805_s23 }
 0x125   : > { %s1143_s23 = smov %s809_s24  ;;  %s1144_s24 = smov %s894_s30 }
 0x126   : > { %s1145_s25 = smov %s883_s27  ;;  %20 = sbr.rel (!%p18_p5) target bundleno = 16 (0x10), region = 122 }
 0x12d   :  { %301 = vsyncpa [#allocation7], 1 }
 0x12e   :  { %303 = vsyncpa [#allocation7 + $0x1], 1 }
 0x12f   :  { %304 = vsyncpa [#allocation8], 1 }
 0x130   :  { %306 = vsyncpa [#allocation8 + $0x1], 1 }
 0x131   :  { %307 = vsyncmov [#allocation3] }
 0x134   :  { %s308_s25 = vpop.sfrf %307 }
 0x135   :  { %p432_p3 = scmp.ne.s32.totalorder %s308_s25, 0 }
 0x137   :  { %312 = shalt.err (%p432_p3)  }
 0x138   :  { %314 = vsyncmov [#allocation3 + $0x1] }
 0x13b   :  { %s315_s4 = vpop.sfrf %314 }
 0x13c   :  { %p433_p6 = scmp.ne.s32.totalorder %s315_s4, 0 }
 0x13e   :  { %319 = shalt.err (%p433_p6)  }
 0x13f   :  { %321 = vsyncmov [#allocation3 + $0x2] }
 0x142   :  { %s322_s5 = vpop.sfrf %321 }
 0x143   :  { %p434_p7 = scmp.ne.s32.totalorder %s322_s5, 0 }
 0x145   :  { %326 = shalt.err (%p434_p7)  }
 0x146   :  { %328 = vsyncmov [#allocation3 + $0x3] }
 0x149   :  { %s329_s30 = vpop.sfrf %328 }
 0x14a   :  { %p435_p10 = scmp.ne.s32.totalorder %s329_s30, 0 }
 0x14c   :  { %333 = shalt.err (%p435_p10)  }
 0x14d   :  { %335 = vsyncmov [#allocation3 + $0x4] }
 0x150   :  { %s336_s1 = vpop.sfrf %335 }
 0x151   :  { %p436_p11 = scmp.ne.s32.totalorder %s336_s1, 0 }
 0x153   :  { %340 = shalt.err (%p436_p11)  }
 0x154   :  { %342 = vsyncmov [#allocation3 + $0x5] }
 0x157   :  { %s343_s3 = vpop.sfrf %342 }
 0x158   :  { %p437_p0 = scmp.ne.s32.totalorder %s343_s3, 0 }
 0x15a   :  { %347 = shalt.err (%p437_p0)  }
 0x15b   :  { %349 = vsyncmov [#allocation3 + $0x6] }
 0x15e   :  { %s350_s22 = vpop.sfrf %349 }
 0x15f   :  { %p438_p2 = scmp.ne.s32.totalorder %s350_s22, 0 }
 0x161   :  { %354 = shalt.err (%p438_p2)  }
 0x162   :  { %356 = vsyncmov [#allocation3 + $0x7] }
 0x165   :  { %s357_s23 = vpop.sfrf %356 }
 0x166   :  { %p439_p4 = scmp.ne.s32.totalorder %s357_s23, 0 }
 0x168   :  { %361 = shalt.err (%p439_p4)  }

</bundles_post_ra>
